<compile_context>
chip_gen: v6e
topology: v6e:2x2x1
jax: 0.10.0
libtpu: 0.0.40
codegen_flags: <defaults>
</compile_context>

<pallas_src>
import functools

import jax
import jax.numpy as jnp
from jax.experimental import pallas as pl
from jax.experimental.pallas import tpu as pltpu

_LANES = 128
_MAX_TILE_ROWS = 512  # 512x128xf32 = 256 KiB per buffer; 6 inputs x 2 bufs ~= 3 MiB VMEM


def _cdiv(a, b):
    return -(-a // b)


def _round_up(a, b):
    return _cdiv(a, b) * b


def _fused_kernel(x0_ref, y0_ref, x1_ref, y1_ref, x2_ref, y2_ref,
                  o0_ref, o1_ref, o2_ref,
                  acc0, acc1, acc2,
                  *, tiles, scales, tile_rows):
    k = pl.program_id(0)
    nsub = tile_rows // 8

    @pl.when(k == 0)
    def _init():
        acc0[...] = jnp.zeros_like(acc0)
        acc1[...] = jnp.zeros_like(acc1)
        acc2[...] = jnp.zeros_like(acc2)

    def _fold(e):
        # (tile_rows, 128) -> (8, 128) partial sums; pure VPU adds across vregs,
        # no cross-lane (XLU) traffic in the steady-state loop.
        return e.reshape(nsub, 8, _LANES).sum(axis=0)

    def _mse_partial(x_ref, y_ref):
        d = x_ref[...] - y_ref[...]
        return _fold(d * d)

    def _smooth_l1_partial(x_ref, y_ref):
        # PyTorch SmoothL1Loss, beta = 1.0 (default).
        d = x_ref[...] - y_ref[...]
        ad = jnp.abs(d)
        return _fold(jnp.where(ad < 1.0, 0.5 * d * d, ad - 0.5))

    @pl.when(k < tiles[0])
    def _acc_mse():
        acc0[...] += _mse_partial(x0_ref, y0_ref)

    @pl.when(k < tiles[1])
    def _acc_sl1_a():
        acc1[...] += _smooth_l1_partial(x1_ref, y1_ref)

    @pl.when(k < tiles[2])
    def _acc_sl1_b():
        acc2[...] += _smooth_l1_partial(x2_ref, y2_ref)

    @pl.when(k == pl.num_programs(0) - 1)
    def _epilogue():
        # One cross-sublane/lane reduce per loss; mean divide + loss scaling folded
        # into a single constant; each (1,1) output written exactly once.
        o0_ref[...] = jnp.sum(acc0[...], keepdims=True) * scales[0]
        o1_ref[...] = jnp.sum(acc1[...], keepdims=True) * scales[1]
        o2_ref[...] = jnp.sum(acc2[...], keepdims=True) * scales[2]


def _flatten_pad(x, tile_rows):
    """Flatten to a lane-dense (n_tiles*tile_rows, 128) f32 slab, zero-padding the tail."""
    size = x.size
    rows = _cdiv(size, _LANES)
    n_tiles = _cdiv(rows, tile_rows)
    padded = n_tiles * tile_rows * _LANES
    flat = x.reshape(-1).astype(jnp.float32)
    if padded != size:
        flat = jnp.pad(flat, (0, padded - size))
    return flat.reshape(n_tiles * tile_rows, _LANES), n_tiles


def triple_loss(es_den, gt_den, gt64, out64, gt256, out256, weights=(1.0, 1.0, 1.0)):
    w1, w2_, w3_ = weights
    _, _, h, w = es_den.shape
    _, _, h2, w2 = gt64.shape
    _, _, h3, w3 = gt256.shape

    # Fold the mean divide and the (w*h/(w+h))*weight scale into one constant per loss.
    scales = (
        (w * h / (w + h)) * float(w1) / es_den.size,
        (w2 * h2 / (w2 + h2)) * float(w2_) / gt64.size,
        (w3 * h3 / (w3 + h3)) * float(w3_) / gt256.size,
    )

    max_rows = max(_cdiv(a.size, _LANES) for a in (es_den, gt64, gt256))
    tile_rows = min(_MAX_TILE_ROWS, _round_up(max(max_rows, 8), 8))

    x0, t0 = _flatten_pad(es_den, tile_rows)
    y0, _ = _flatten_pad(gt_den, tile_rows)
    x1, t1 = _flatten_pad(out64, tile_rows)
    y1, _ = _flatten_pad(gt64, tile_rows)
    x2, t2 = _flatten_pad(out256, tile_rows)
    y2, _ = _flatten_pad(gt256, tile_rows)

    tiles = (t0, t1, t2)
    grid = (max(tiles),)

    def _in_spec(n_tiles):
        # Clamp past-the-end steps to the last real tile (block index stops changing,
        # so no extra DMA); accumulation is skipped by pl.when in the kernel.
        return pl.BlockSpec(
            (tile_rows, _LANES),
            lambda k, n=n_tiles: (jnp.minimum(k, n - 1), 0),
        )

    kernel = functools.partial(
        _fused_kernel, tiles=tiles, scales=scales, tile_rows=tile_rows
    )

    scalar_spec = pl.BlockSpec((1, 1), lambda k: (0, 0))
    out = pl.pallas_call(
        kernel,
        grid=grid,
        out_shape=(
            jax.ShapeDtypeStruct((1, 1), jnp.float32),
            jax.ShapeDtypeStruct((1, 1), jnp.float32),
            jax.ShapeDtypeStruct((1, 1), jnp.float32),
        ),
        in_specs=[
            _in_spec(t0), _in_spec(t0),
            _in_spec(t1), _in_spec(t1),
            _in_spec(t2), _in_spec(t2),
        ],
        out_specs=(scalar_spec, scalar_spec, scalar_spec),
        scratch_shapes=[
            pltpu.VMEM((8, _LANES), jnp.float32),
            pltpu.VMEM((8, _LANES), jnp.float32),
            pltpu.VMEM((8, _LANES), jnp.float32),
        ],
        compiler_params=pltpu.CompilerParams(
            dimension_semantics=("arbitrary",),  # reduction axis with resident accumulators
        ),
    )(x0, y0, x1, y1, x2, y2)

    maaloss, perception1, perception2 = (o[0, 0] for o in out)
    return maaloss, perception1, perception2


def _ref_triple_loss(es_den, gt_den, gt64, out64, gt256, out256, weights):
    def mse(a, b):
        return jnp.mean((a - b) ** 2)

    def smooth_l1(a, b):
        d = a - b
        ad = jnp.abs(d)
        return jnp.mean(jnp.where(ad < 1.0, 0.5 * d * d, ad - 0.5))

    w1, w2_, w3_ = weights
    _, _, h, w = es_den.shape
    _, _, h2, w2 = gt64.shape
    _, _, h3, w3 = gt256.shape
    return (
        mse(es_den, gt_den) * (w * h / (w + h)) * w1,
        smooth_l1(out64, gt64) * (w2 * h2 / (w2 + h2)) * w2_,
        smooth_l1(out256, gt256) * (w3 * h3 / (w3 + h3)) * w3_,
    )


if __name__ == "__main__":
    key = jax.random.PRNGKey(0)
    ks = jax.random.split(key, 6)

    # Small shapes consistent with the forward's NCHW inputs.
    es_den = jax.random.normal(ks[0], (2, 1, 16, 16), dtype=jnp.float32)
    gt_den = jax.random.normal(ks[1], (2, 1, 16, 16), dtype=jnp.float32)
    gt64 = jax.random.normal(ks[2], (2, 4, 8, 8), dtype=jnp.float32)
    out64 = jax.random.normal(ks[3], (2, 4, 8, 8), dtype=jnp.float32)
    gt256 = jax.random.normal(ks[4], (2, 4, 16, 16), dtype=jnp.float32)
    out256 = jax.random.normal(ks[5], (2, 4, 16, 16), dtype=jnp.float32)

    weights = (1.0, 0.5, 0.25)  # deterministic args[0], args[1], args[2]

    losses = triple_loss(es_den, gt_den, gt64, out64, gt256, out256, weights)
    losses = jax.block_until_ready(losses)

    ref = _ref_triple_loss(es_den, gt_den, gt64, out64, gt256, out256, weights)
    for got, want in zip(losses, ref):
        assert jnp.allclose(got, want, rtol=1e-5, atol=1e-5), (got, want)

    print("KERNEL_OK")
</pallas_src>

<mosaic_0001>
module attributes {stable_mosaic.version = 11 : i64} {
  func.func @_fused_kernel(%arg0: i32, %arg1: memref<16x128xf32, #tpu.memory_space<vmem>>, %arg2: memref<16x128xf32, #tpu.memory_space<vmem>>, %arg3: memref<16x128xf32, #tpu.memory_space<vmem>>, %arg4: memref<16x128xf32, #tpu.memory_space<vmem>>, %arg5: memref<16x128xf32, #tpu.memory_space<vmem>>, %arg6: memref<16x128xf32, #tpu.memory_space<vmem>>, %arg7: memref<1x1xf32, #tpu.memory_space<vmem>>, %arg8: memref<1x1xf32, #tpu.memory_space<vmem>>, %arg9: memref<1x1xf32, #tpu.memory_space<vmem>>, %arg10: memref<8x128xf32, #tpu.memory_space<vmem>>, %arg11: memref<8x128xf32, #tpu.memory_space<vmem>>, %arg12: memref<8x128xf32, #tpu.memory_space<vmem>>) attributes {dimension_semantics = [#tpu.dimension_semantics<arbitrary>], iteration_bounds = array<i64: 1>, scalar_prefetch = 0 : i64, scratch_operands = 3 : i64, tpu.core_type = #tpu.core_type<tc>, window_params = [{transform_indices = @transform_0, window_bounds = array<i64: 16, 128>}, {transform_indices = @transform_1, window_bounds = array<i64: 16, 128>}, {transform_indices = @transform_2, window_bounds = array<i64: 16, 128>}, {transform_indices = @transform_3, window_bounds = array<i64: 16, 128>}, {transform_indices = @transform_4, window_bounds = array<i64: 16, 128>}, {transform_indices = @transform_5, window_bounds = array<i64: 16, 128>}, {pipeline_mode = #tpu.pipeline_mode<synchronous>, transform_indices = @transform_6, window_bounds = array<i64: 1, 1>}, {pipeline_mode = #tpu.pipeline_mode<synchronous>, transform_indices = @transform_7, window_bounds = array<i64: 1, 1>}, {pipeline_mode = #tpu.pipeline_mode<synchronous>, transform_indices = @transform_8, window_bounds = array<i64: 1, 1>}]} {
    %c0_i32 = arith.constant 0 : i32
    %0 = arith.cmpi eq, %arg0, %c0_i32 : i32
    %1 = arith.extui %0 : i1 to i32
    %c0_i32_0 = arith.constant 0 : i32
    %2 = arith.cmpi ne, %1, %c0_i32_0 : i32
    scf.if %2 {
      %cst = arith.constant 0.000000e+00 : f32
      %15 = vector.broadcast %cst : f32 to vector<8x128xf32>
      %c0 = arith.constant 0 : index
      %c0_8 = arith.constant 0 : index
      %16 = vector.load %arg10[%c0, %c0_8] : memref<8x128xf32, #tpu.memory_space<vmem>>, vector<8x128xf32>
      tpu.vector_store %arg10[%c0, %c0_8], %15 {strides = array<i32>} : memref<8x128xf32, #tpu.memory_space<vmem>>, vector<8x128xf32>,
      %cst_9 = arith.constant 0.000000e+00 : f32
      %17 = vector.broadcast %cst_9 : f32 to vector<8x128xf32>
      %c0_10 = arith.constant 0 : index
      %c0_11 = arith.constant 0 : index
      %18 = vector.load %arg11[%c0_10, %c0_11] : memref<8x128xf32, #tpu.memory_space<vmem>>, vector<8x128xf32>
      tpu.vector_store %arg11[%c0_10, %c0_11], %17 {strides = array<i32>} : memref<8x128xf32, #tpu.memory_space<vmem>>, vector<8x128xf32>,
      %cst_12 = arith.constant 0.000000e+00 : f32
      %19 = vector.broadcast %cst_12 : f32 to vector<8x128xf32>
      %c0_13 = arith.constant 0 : index
      %c0_14 = arith.constant 0 : index
      %20 = vector.load %arg12[%c0_13, %c0_14] : memref<8x128xf32, #tpu.memory_space<vmem>>, vector<8x128xf32>
      tpu.vector_store %arg12[%c0_13, %c0_14], %19 {strides = array<i32>} : memref<8x128xf32, #tpu.memory_space<vmem>>, vector<8x128xf32>,
    } else {
    }
    %c1_i32 = arith.constant 1 : i32
    %3 = arith.cmpi slt, %arg0, %c1_i32 : i32
    %4 = arith.extui %3 : i1 to i32
    %c0_i32_1 = arith.constant 0 : i32
    %5 = arith.cmpi ne, %4, %c0_i32_1 : i32
    scf.if %5 {
      %c0 = arith.constant 0 : index
      %c0_8 = arith.constant 0 : index
      %15 = vector.load %arg10[%c0, %c0_8] : memref<8x128xf32, #tpu.memory_space<vmem>>, vector<8x128xf32>
      %c0_9 = arith.constant 0 : index
      %c0_10 = arith.constant 0 : index
      %16 = vector.load %arg1[%c0_9, %c0_10] : memref<16x128xf32, #tpu.memory_space<vmem>>, vector<16x128xf32>
      %c0_11 = arith.constant 0 : index
      %c0_12 = arith.constant 0 : index
      %17 = vector.load %arg2[%c0_11, %c0_12] : memref<16x128xf32, #tpu.memory_space<vmem>>, vector<16x128xf32>
      %18 = arith.subf %16, %17 : vector<16x128xf32>
      %19 = arith.mulf %18, %18 : vector<16x128xf32>
      %20 = vector.shape_cast %19 : vector<16x128xf32> to vector<2x8x128xf32>
      %cst = arith.constant dense<0.000000e+00> : vector<8x128xf32>
      %21 = vector.multi_reduction <add>, %20, %cst [0] : vector<2x8x128xf32> to vector<8x128xf32>
      %22 = arith.addf %15, %21 : vector<8x128xf32>
      %c0_13 = arith.constant 0 : index
      %c0_14 = arith.constant 0 : index
      %23 = vector.load %arg10[%c0_13, %c0_14] : memref<8x128xf32, #tpu.memory_space<vmem>>, vector<8x128xf32>
      tpu.vector_store %arg10[%c0_13, %c0_14], %22 {strides = array<i32>} : memref<8x128xf32, #tpu.memory_space<vmem>>, vector<8x128xf32>,
    } else {
    }
    %c1_i32_2 = arith.constant 1 : i32
    %6 = arith.cmpi slt, %arg0, %c1_i32_2 : i32
    %7 = arith.extui %6 : i1 to i32
    %c0_i32_3 = arith.constant 0 : i32
    %8 = arith.cmpi ne, %7, %c0_i32_3 : i32
    scf.if %8 {
      %c0 = arith.constant 0 : index
      %c0_8 = arith.constant 0 : index
      %15 = vector.load %arg11[%c0, %c0_8] : memref<8x128xf32, #tpu.memory_space<vmem>>, vector<8x128xf32>
      %c0_9 = arith.constant 0 : index
      %c0_10 = arith.constant 0 : index
      %16 = vector.load %arg3[%c0_9, %c0_10] : memref<16x128xf32, #tpu.memory_space<vmem>>, vector<16x128xf32>
      %c0_11 = arith.constant 0 : index
      %c0_12 = arith.constant 0 : index
      %17 = vector.load %arg4[%c0_11, %c0_12] : memref<16x128xf32, #tpu.memory_space<vmem>>, vector<16x128xf32>
      %18 = arith.subf %16, %17 : vector<16x128xf32>
      %19 = math.absf %18 : vector<16x128xf32>
      %cst = arith.constant 1.000000e+00 : f32
      %20 = vector.broadcast %cst : f32 to vector<16x128xf32>
      %21 = arith.cmpf olt, %19, %20 : vector<16x128xf32>
      %cst_13 = arith.constant 5.000000e-01 : f32
      %22 = vector.broadcast %cst_13 : f32 to vector<16x128xf32>
      %23 = arith.mulf %22, %18 : vector<16x128xf32>
      %24 = arith.mulf %23, %18 : vector<16x128xf32>
      %cst_14 = arith.constant 5.000000e-01 : f32
      %25 = vector.broadcast %cst_14 : f32 to vector<16x128xf32>
      %26 = arith.subf %19, %25 : vector<16x128xf32>
      %27 = arith.select %21, %24, %26 : vector<16x128xi1>, vector<16x128xf32>
      %28 = vector.shape_cast %27 : vector<16x128xf32> to vector<2x8x128xf32>
      %cst_15 = arith.constant dense<0.000000e+00> : vector<8x128xf32>
      %29 = vector.multi_reduction <add>, %28, %cst_15 [0] : vector<2x8x128xf32> to vector<8x128xf32>
      %30 = arith.addf %15, %29 : vector<8x128xf32>
      %c0_16 = arith.constant 0 : index
      %c0_17 = arith.constant 0 : index
      %31 = vector.load %arg11[%c0_16, %c0_17] : memref<8x128xf32, #tpu.memory_space<vmem>>, vector<8x128xf32>
      tpu.vector_store %arg11[%c0_16, %c0_17], %30 {strides = array<i32>} : memref<8x128xf32, #tpu.memory_space<vmem>>, vector<8x128xf32>,
    } else {
    }
    %c1_i32_4 = arith.constant 1 : i32
    %9 = arith.cmpi slt, %arg0, %c1_i32_4 : i32
    %10 = arith.extui %9 : i1 to i32
    %c0_i32_5 = arith.constant 0 : i32
    %11 = arith.cmpi ne, %10, %c0_i32_5 : i32
    scf.if %11 {
      %c0 = arith.constant 0 : index
      %c0_8 = arith.constant 0 : index
      %15 = vector.load %arg12[%c0, %c0_8] : memref<8x128xf32, #tpu.memory_space<vmem>>, vector<8x128xf32>
      %c0_9 = arith.constant 0 : index
      %c0_10 = arith.constant 0 : index
      %16 = vector.load %arg5[%c0_9, %c0_10] : memref<16x128xf32, #tpu.memory_space<vmem>>, vector<16x128xf32>
      %c0_11 = arith.constant 0 : index
      %c0_12 = arith.constant 0 : index
      %17 = vector.load %arg6[%c0_11, %c0_12] : memref<16x128xf32, #tpu.memory_space<vmem>>, vector<16x128xf32>
      %18 = arith.subf %16, %17 : vector<16x128xf32>
      %19 = math.absf %18 : vector<16x128xf32>
      %cst = arith.constant 1.000000e+00 : f32
      %20 = vector.broadcast %cst : f32 to vector<16x128xf32>
      %21 = arith.cmpf olt, %19, %20 : vector<16x128xf32>
      %cst_13 = arith.constant 5.000000e-01 : f32
      %22 = vector.broadcast %cst_13 : f32 to vector<16x128xf32>
      %23 = arith.mulf %22, %18 : vector<16x128xf32>
      %24 = arith.mulf %23, %18 : vector<16x128xf32>
      %cst_14 = arith.constant 5.000000e-01 : f32
      %25 = vector.broadcast %cst_14 : f32 to vector<16x128xf32>
      %26 = arith.subf %19, %25 : vector<16x128xf32>
      %27 = arith.select %21, %24, %26 : vector<16x128xi1>, vector<16x128xf32>
      %28 = vector.shape_cast %27 : vector<16x128xf32> to vector<2x8x128xf32>
      %cst_15 = arith.constant dense<0.000000e+00> : vector<8x128xf32>
      %29 = vector.multi_reduction <add>, %28, %cst_15 [0] : vector<2x8x128xf32> to vector<8x128xf32>
      %30 = arith.addf %15, %29 : vector<8x128xf32>
      %c0_16 = arith.constant 0 : index
      %c0_17 = arith.constant 0 : index
      %31 = vector.load %arg12[%c0_16, %c0_17] : memref<8x128xf32, #tpu.memory_space<vmem>>, vector<8x128xf32>
      tpu.vector_store %arg12[%c0_16, %c0_17], %30 {strides = array<i32>} : memref<8x128xf32, #tpu.memory_space<vmem>>, vector<8x128xf32>,
    } else {
    }
    %c0_i32_6 = arith.constant 0 : i32
    %12 = arith.cmpi eq, %arg0, %c0_i32_6 : i32
    %13 = arith.extui %12 : i1 to i32
    %c0_i32_7 = arith.constant 0 : i32
    %14 = arith.cmpi ne, %13, %c0_i32_7 : i32
    scf.if %14 {
      %c0 = arith.constant 0 : index
      %c0_8 = arith.constant 0 : index
      %15 = vector.load %arg10[%c0, %c0_8] : memref<8x128xf32, #tpu.memory_space<vmem>>, vector<8x128xf32>
      %16 = vector.shape_cast %15 : vector<8x128xf32> to vector<1x8x128xf32>
      %cst = arith.constant dense<0.000000e+00> : vector<1xf32>
      %17 = vector.multi_reduction <add>, %16, %cst [1, 2] : vector<1x8x128xf32> to vector<1xf32>
      %18 = vector.shape_cast %17 : vector<1xf32> to vector<1x1x1xf32>
      %19 = vector.extract %18[0, 0, 0] : f32 from vector<1x1x1xf32>
      %20 = vector.broadcast %19 : f32 to vector<1x1xf32>
      %cst_9 = arith.constant 1.562500e-02 : f32
      %21 = vector.broadcast %cst_9 : f32 to vector<1x1xf32>
      %22 = arith.mulf %20, %21 : vector<1x1xf32>
      %c0_10 = arith.constant 0 : index
      %c0_11 = arith.constant 0 : index
      %23 = vector.load %arg7[%c0_10, %c0_11] : memref<1x1xf32, #tpu.memory_space<vmem>>, vector<1x1xf32>
      tpu.vector_store %arg7[%c0_10, %c0_11], %22 {strides = array<i32>} : memref<1x1xf32, #tpu.memory_space<vmem>>, vector<1x1xf32>,
      %c0_12 = arith.constant 0 : index
      %c0_13 = arith.constant 0 : index
      %24 = vector.load %arg11[%c0_12, %c0_13] : memref<8x128xf32, #tpu.memory_space<vmem>>, vector<8x128xf32>
      %25 = vector.shape_cast %24 : vector<8x128xf32> to vector<1x8x128xf32>
      %cst_14 = arith.constant dense<0.000000e+00> : vector<1xf32>
      %26 = vector.multi_reduction <add>, %25, %cst_14 [1, 2] : vector<1x8x128xf32> to vector<1xf32>
      %27 = vector.shape_cast %26 : vector<1xf32> to vector<1x1x1xf32>
      %28 = vector.extract %27[0, 0, 0] : f32 from vector<1x1x1xf32>
      %29 = vector.broadcast %28 : f32 to vector<1x1xf32>
      %cst_15 = arith.constant 3.906250e-03 : f32
      %30 = vector.broadcast %cst_15 : f32 to vector<1x1xf32>
      %31 = arith.mulf %29, %30 : vector<1x1xf32>
      %c0_16 = arith.constant 0 : index
      %c0_17 = arith.constant 0 : index
      %32 = vector.load %arg8[%c0_16, %c0_17] : memref<1x1xf32, #tpu.memory_space<vmem>>, vector<1x1xf32>
      tpu.vector_store %arg8[%c0_16, %c0_17], %31 {strides = array<i32>} : memref<1x1xf32, #tpu.memory_space<vmem>>, vector<1x1xf32>,
      %c0_18 = arith.constant 0 : index
      %c0_19 = arith.constant 0 : index
      %33 = vector.load %arg12[%c0_18, %c0_19] : memref<8x128xf32, #tpu.memory_space<vmem>>, vector<8x128xf32>
      %34 = vector.shape_cast %33 : vector<8x128xf32> to vector<1x8x128xf32>
      %cst_20 = arith.constant dense<0.000000e+00> : vector<1xf32>
      %35 = vector.multi_reduction <add>, %34, %cst_20 [1, 2] : vector<1x8x128xf32> to vector<1xf32>
      %36 = vector.shape_cast %35 : vector<1xf32> to vector<1x1x1xf32>
      %37 = vector.extract %36[0, 0, 0] : f32 from vector<1x1x1xf32>
      %38 = vector.broadcast %37 : f32 to vector<1x1xf32>
      %cst_21 = arith.constant 9.765625E-4 : f32
      %39 = vector.broadcast %cst_21 : f32 to vector<1x1xf32>
      %40 = arith.mulf %38, %39 : vector<1x1xf32>
      %c0_22 = arith.constant 0 : index
      %c0_23 = arith.constant 0 : index
      %41 = vector.load %arg9[%c0_22, %c0_23] : memref<1x1xf32, #tpu.memory_space<vmem>>, vector<1x1xf32>
      tpu.vector_store %arg9[%c0_22, %c0_23], %40 {strides = array<i32>} : memref<1x1xf32, #tpu.memory_space<vmem>>, vector<1x1xf32>,
    } else {
    }
    return
  }
  func.func @transform_0(%arg0: i32) -> (i32, i32) {
    %c0_i32 = arith.constant 0 : i32
    %0 = arith.minsi %arg0, %c0_i32 : i32
    %c0_i32_0 = arith.constant 0 : i32
    %c0_i32_1 = arith.constant 0 : i32
    return %0, %c0_i32_0 : i32, i32
  }
  func.func @transform_1(%arg0: i32) -> (i32, i32) {
    %c0_i32 = arith.constant 0 : i32
    %0 = arith.minsi %arg0, %c0_i32 : i32
    %c0_i32_0 = arith.constant 0 : i32
    %c0_i32_1 = arith.constant 0 : i32
    return %0, %c0_i32_0 : i32, i32
  }
  func.func @transform_2(%arg0: i32) -> (i32, i32) {
    %c0_i32 = arith.constant 0 : i32
    %0 = arith.minsi %arg0, %c0_i32 : i32
    %c0_i32_0 = arith.constant 0 : i32
    %c0_i32_1 = arith.constant 0 : i32
    return %0, %c0_i32_0 : i32, i32
  }
  func.func @transform_3(%arg0: i32) -> (i32, i32) {
    %c0_i32 = arith.constant 0 : i32
    %0 = arith.minsi %arg0, %c0_i32 : i32
    %c0_i32_0 = arith.constant 0 : i32
    %c0_i32_1 = arith.constant 0 : i32
    return %0, %c0_i32_0 : i32, i32
  }
  func.func @transform_4(%arg0: i32) -> (i32, i32) {
    %c0_i32 = arith.constant 0 : i32
    %0 = arith.minsi %arg0, %c0_i32 : i32
    %c0_i32_0 = arith.constant 0 : i32
    %c0_i32_1 = arith.constant 0 : i32
    return %0, %c0_i32_0 : i32, i32
  }
  func.func @transform_5(%arg0: i32) -> (i32, i32) {
    %c0_i32 = arith.constant 0 : i32
    %0 = arith.minsi %arg0, %c0_i32 : i32
    %c0_i32_0 = arith.constant 0 : i32
    %c0_i32_1 = arith.constant 0 : i32
    return %0, %c0_i32_0 : i32, i32
  }
  func.func @transform_6(%arg0: i32) -> (i32, i32) {
    %c0_i32 = arith.constant 0 : i32
    %c0_i32_0 = arith.constant 0 : i32
    %c0_i32_1 = arith.constant 0 : i32
    return %c0_i32, %c0_i32_0 : i32, i32
  }
  func.func @transform_7(%arg0: i32) -> (i32, i32) {
    %c0_i32 = arith.constant 0 : i32
    %c0_i32_0 = arith.constant 0 : i32
    %c0_i32_1 = arith.constant 0 : i32
    return %c0_i32, %c0_i32_0 : i32, i32
  }
  func.func @transform_8(%arg0: i32) -> (i32, i32) {
    %c0_i32 = arith.constant 0 : i32
    %c0_i32_0 = arith.constant 0 : i32
    %c0_i32_1 = arith.constant 0 : i32
    return %c0_i32, %c0_i32_0 : i32, i32
  }
}

</mosaic_0001>

<bundles_post_ra>
// kernel: tpu_custom_call.1
= control target key start
LH: loop header
LB: loop body
LE: loop exit
PB: predicated region body
PF: predicated region fallthrough
CT: control target
= control target key end

     0   :  { %14 = vsyncpa [#allocation6], 0  ;;  %s582_s0 = inlined_call_operand.hbm [shape: f32[16,128], index: 0, kind: input, shape index: {}]   ;;  %s583_s1 = inlined_call_operand.hbm [shape: f32[16,128], index: 1, kind: input, shape index: {}]   ;;  %s584_s2 = inlined_call_operand.hbm [shape: f32[16,128], index: 2, kind: input, shape index: {}]   ;;  %s585_s3 = inlined_call_operand.hbm [shape: f32[16,128], index: 3, kind: input, shape index: {}]   ;;  %s586_s4 = inlined_call_operand.hbm [shape: f32[16,128], index: 4, kind: input, shape index: {}]   ;;  %s587_s5 = inlined_call_operand.hbm [shape: f32[16,128], index: 5, kind: input, shape index: {}]   ;;  %s588_s6 = inlined_call_operand.hbm [shape: f32[1,1], index: 6, kind: output, shape index: {0}]   ;;  %s589_s7 = inlined_call_operand.hbm [shape: f32[1,1], index: 7, kind: output, shape index: {1}]   ;;  %s590_s8 = inlined_call_operand.hbm [shape: f32[1,1], index: 8, kind: output, shape index: {2}]  }
   0x1   :  { %15 = vsyncpa [#allocation9], 0 }
   0x2   :  { %16 = vsyncpa [#allocation12], 0 }
   0x3   :  { %17 = vsyncpa [#allocation15], 0 }
   0x4   :  { %18 = vsyncpa [#allocation7], 0 }
   0x5   :  { %19 = vsyncpa [#allocation18], 0  ;;  %s478_s27 = smov [#allocation8]   ;;  %s479_s29 = smov [#allocation11]  }
   0x6   :  { %s37_s28 = sshll.u32 %s478_s27, 4  ;;  %s61_s30 = sshll.u32 %s479_s29, 4  ;;  %s38_s28 = int_to_ptr.vmem [resolvable:$true] %s37_s28  ;;  %s62_s30 = int_to_ptr.vmem [resolvable:$true] %s61_s30 }
   0x7   :  { %s294_s9 = scalar_lea.vmem %s38_s28, 256  ;;  %p299_p1 = scmp.lt.s32.totalorder %s38_s28, %s38_s28 }
   0x8   :  { %p295_p0 = scmp.ne.s32.totalorder %s38_s28, %s294_s9  ;;  %p300_p2 = scmp.lt.s32.totalorder %s294_s9, %s294_s9 }
   0xa   :  { %p301_p3 = por %p300_p2, %p299_p1 }
   0xc   :  { %p302_p4 = pnand %p301_p3, %p295_p0 }
   0xe   :  { %305 = shalt.err (!%p302_p4)
}
   0xf   :  { %s480_s10 = smov 128   ;;  %s481_s11 = smov 8  }
  0x10   :  { %43 = dma.hbm_to_vmem [thread:$0]  %s583_s1, 256, %s38_s28, [#allocation9], %s480_s10, %s480_s10, %s481_s11  }
  0x11   :  { %s314_s14 = scalar_lea.vmem %s62_s30, 256  ;;  %p319_p6 = scmp.lt.s32.totalorder %s62_s30, %s62_s30 }
  0x12   :  { %p315_p5 = scmp.ne.s32.totalorder %s62_s30, %s314_s14  ;;  %p320_p7 = scmp.lt.s32.totalorder %s314_s14, %s314_s14 }
  0x14   :  { %p321_p8 = por %p320_p7, %p319_p6 }
  0x16   :  { %p322_p9 = pnand %p321_p8, %p315_p5 }
  0x18   :  { %325 = shalt.err (!%p322_p9)
}
  0x19   :  { %67 = dma.hbm_to_vmem [thread:$0]  %s585_s3, 256, %s62_s30, [#allocation12], %s480_s10, %s480_s10, %s481_s11  }
  0x1a   :  { %s482_s17 = smov [#allocation5]   ;;  %s483_s19 = smov [#allocation10]  }
  0x1b   :  { %s25_s18 = sshll.u32 %s482_s17, 4  ;;  %s49_s20 = sshll.u32 %s483_s19, 4  ;;  %s26_s18 = int_to_ptr.vmem [resolvable:$true] %s25_s18  ;;  %s50_s20 = int_to_ptr.vmem [resolvable:$true] %s49_s20 }
  0x1c   :  { %s334_s1 = scalar_lea.vmem %s26_s18, 256  ;;  %p339_p11 = scmp.lt.s32.totalorder %s26_s18, %s26_s18 }
  0x1d   :  { %p335_p10 = scmp.ne.s32.totalorder %s26_s18, %s334_s1  ;;  %p340_p12 = scmp.lt.s32.totalorder %s334_s1, %s334_s1 }
  0x1f   :  { %p341_p13 = por %p340_p12, %p339_p11 }
  0x21   :  { %p342_p0 = pnand %p341_p13, %p335_p10 }
  0x23   :  { %345 = shalt.err (!%p342_p0)
}
  0x24   :  { %31 = dma.hbm_to_vmem [thread:$0]  %s582_s0, 256, %s26_s18, [#allocation6], %s480_s10, %s480_s10, %s481_s11  }
  0x25   :  { %s354_s3 = scalar_lea.vmem %s50_s20, 256  ;;  %p359_p2 = scmp.lt.s32.totalorder %s50_s20, %s50_s20 }
  0x26   :  { %p355_p1 = scmp.ne.s32.totalorder %s50_s20, %s354_s3  ;;  %p360_p3 = scmp.lt.s32.totalorder %s354_s3, %s354_s3 }
  0x28   :  { %p361_p4 = por %p360_p3, %p359_p2 }
  0x2a   :  { %p362_p5 = pnand %p361_p4, %p355_p1 }
  0x2c   :  { %365 = shalt.err (!%p362_p5)
}
  0x2d   :  { %55 = dma.hbm_to_vmem [thread:$0]  %s584_s2, 256, %s50_s20, [#allocation9], %s480_s10, %s480_s10, %s481_s11  }
  0x2e   :  { %s484_s25 = smov [#allocation13]   ;;  %s485_s27 = smov [#allocation14]  }
  0x2f   :  { %s73_s26 = sshll.u32 %s484_s25, 4  ;;  %s85_s28 = sshll.u32 %s485_s27, 4  ;;  %s74_s26 = int_to_ptr.vmem [resolvable:$true] %s73_s26  ;;  %s86_s28 = int_to_ptr.vmem [resolvable:$true] %s85_s28 }
  0x30   :  { %s374_s0 = scalar_lea.vmem %s74_s26, 256  ;;  %p379_p7 = scmp.lt.s32.totalorder %s74_s26, %s74_s26 }
  0x31   :  { %p375_p6 = scmp.ne.s32.totalorder %s74_s26, %s374_s0  ;;  %p380_p8 = scmp.lt.s32.totalorder %s374_s0, %s374_s0 }
  0x33   :  { %p381_p9 = por %p380_p8, %p379_p7 }
  0x35   :  { %p382_p10 = pnand %p381_p9, %p375_p6 }
  0x37   :  { %385 = shalt.err (!%p382_p10)
}
  0x38   :  { %79 = dma.hbm_to_vmem [thread:$0]  %s586_s4, 256, %s74_s26, [#allocation12], %s480_s10, %s480_s10, %s481_s11  }
  0x39   :  { %s394_s2 = scalar_lea.vmem %s86_s28, 256  ;;  %p399_p12 = scmp.lt.s32.totalorder %s86_s28, %s86_s28 }
  0x3a   :  { %p395_p11 = scmp.ne.s32.totalorder %s86_s28, %s394_s2  ;;  %p400_p13 = scmp.lt.s32.totalorder %s394_s2, %s394_s2 }
  0x3c   :  { %p401_p0 = por %p400_p13, %p399_p12 }
  0x3e   :  { %p402_p1 = pnand %p401_p0, %p395_p11 }
  0x40   :  { %405 = shalt.err (!%p402_p1)
}
  0x41   :  { %91 = dma.hbm_to_vmem [thread:$0]  %s587_s5, 256, %s86_s28, [#allocation15], %s480_s10, %s480_s10, %s481_s11  }
  0x42   :  { %466 = dma.done.wait [#allocation6], 256  }
  0x43   :  { %467 = vsyncadd [#allocation6], 4294967040 }
  0x44   :  { %468 = dma.done.wait [#allocation9], 512  }
  0x45   :  { %469 = vsyncadd [#allocation9], 4294966784 }
  0x46   :  { %470 = dma.done.wait [#allocation12], 512  }
  0x47   :  { %471 = vsyncadd [#allocation12], 4294966784 }
  0x48   :  { %472 = dma.done.wait [#allocation15], 256  }
  0x49   :  { %473 = vsyncadd [#allocation15], 4294967040  ;;  %v122_v0 = vld [vmem:[#allocation5] sm:$0xff]  ;;  %v123_v1 = vld [vmem:[#allocation5 + $0x8] sm:$0xff]  ;;  %s486_s4 = smov [#allocation16]   ;;  %vm192_vm4 = vcmask 0  }
  0x4a   :  { %v124_v2 = vld [vmem:[#allocation8] sm:$0xff]  ;;  %v125_v3 = vld [vmem:[#allocation8 + $0x8] sm:$0xff]  ;;  %v156_v5 = vld [vmem:[#allocation13] sm:$0xff]  ;;  %s226_s5 = sshll.u32 %s486_s4, 4  ;;  %s227_s5 = int_to_ptr.vmem [resolvable:$true] %s226_s5 }
  0x4b   :  { %v126_v4 = vsub.f32 %v122_v0, %v124_v2  ;;  %v157_v6 = vld [vmem:[#allocation13 + $0x8] sm:$0xff]  ;;  %v127_v7 = vsub.f32 %v123_v1, %v125_v3  ;;  %v158_v8 = vld [vmem:[#allocation14] sm:$0xff]  ;;  %v159_v9 = vld [vmem:[#allocation14 + $0x8] sm:$0xff]  ;;  %s406_s11 = scalar_lea.vmem %s227_s5, 16  ;;  %s410_s13 = scalar_lea.vmem %s227_s5, 32 }
  0x4c   :  { %v134_v10 = vld [vmem:[#allocation10] sm:$0xff]  ;;  %v160_v12 = vsub.f32 %v156_v5, %v158_v8  ;;  %v161_v13 = vsub.f32 %v157_v6, %v159_v9  ;;  %v135_v14 = vld [vmem:[#allocation10 + $0x8] sm:$0xff]  ;;  %v136_v15 = vld [vmem:[#allocation11] sm:$0xff]  ;;  %p407_p2 = scmp.ne.s32.totalorder %s227_s5, %s406_s11  ;;  %p411_p3 = scmp.lt.s32.totalorder %s227_s5, %s227_s5 }
  0x4d   :  { %v128_v11 = vmul.f32 %v126_v4, %v126_v4  ;;  %v137_v16 = vld [vmem:[#allocation11 + $0x8] sm:$0xff]  ;;  %v129_v17 = vmul.f32 %v127_v7, %v127_v7  ;;  %v138_v18 = vsub.f32 %v134_v10, %v136_v15  ;;  %p412_p4 = scmp.lt.s32.totalorder %s410_s13, %s406_s11 }
  0x4e   :  { %v139_v19 = vsub.f32 %v135_v14, %v137_v16  ;;  %v162_v20 = vand.u32 2147483647, %v160_v12  ;;  %v163_v21 = vand.u32 2147483647, %v161_v13  ;;  %v166_v22 = vmul.f32 0.5, %v160_v12 }
  0x4f   :  { %v167_v23 = vmul.f32 0.5, %v161_v13  ;;  %v130_v24 = vadd.f32 %v129_v17, %v128_v11  ;;  %v140_v25 = vand.u32 2147483647, %v138_v18  ;;  %v144_v27 = vmul.f32 0.5, %v138_v18  ;;  %p413_p5 = por %p412_p4, %p411_p3 }
  0x50   :  { %v141_v26 = vand.u32 2147483647, %v139_v19  ;;  %vm164_vm0 = vcmp.lt.f32.partialorder %v162_v20, 1.0  ;;  %vm165_vm1 = vcmp.lt.f32.partialorder %v163_v21, 1.0  ;;  %v168_v28 = vmul.f32 %v166_v22, %v160_v12 }
  0x51   :  { %v169_v29 = vmul.f32 %v167_v23, %v161_v13  ;;  %181 = vadd.xlane.f32.xlu0 %v130_v24  ;;  %v267_v30 = vadd.f32 -0.5, %v162_v20  ;;  %v268_v31 = vadd.f32 -0.5, %v163_v21  ;;  %vm142_vm2 = vcmp.lt.f32.partialorder %v140_v25, 1.0  ;;  %p414_p6 = pnand %p413_p5, %p407_p2 }
  0x52   :  { %v145_v32 = vmul.f32 0.5, %v139_v19  ;;  %v146_v33 = vmul.f32 %v144_v27, %v138_v18  ;;  %v265_v34 = vadd.f32 -0.5, %v140_v25  ;;  %v266_v35 = vadd.f32 -0.5, %v141_v26 }
  0x53   :  { %v172_v36 = vsel %vm164_vm0, %v168_v28, %v267_v30  ;;  %v173_v37 = vsel %vm165_vm1, %v169_v29, %v268_v31  ;;  %vm143_vm3 = vcmp.lt.f32.partialorder %v141_v26, 1.0 }
  0x54   :  { %v174_v38 = vadd.f32 %v173_v37, %v172_v36  ;;  %v147_v39 = vmul.f32 %v145_v32, %v139_v19  ;;  %v150_v40 = vsel %vm142_vm2, %v146_v33, %v265_v34 }
  0x56   :  { %208 = vadd.xlane.f32.xlu1 %v174_v38  ;;  %v151_v41 = vsel %vm143_vm3, %v147_v39, %v266_v35 }
  0x57   :  { %v152_v42 = vadd.f32 %v151_v41, %v150_v40 }
  0x59   :  { %195 = vadd.xlane.f32.xlu0 %v152_v42 }
  0xda   :  { %v182_v43 = vpop.xlane.xlu0 %181 }
  0xdb   :  { %v183_v44 = vrot.slane %v182_v43, 4 }
  0xdd   :  { %v184_v45 = vadd.f32 %v183_v44, %v182_v43 }
  0xdf   :  { %v185_v46 = vrot.slane %v184_v45, 2  ;;  %v209_v47 = vpop.xlane.xlu1 %208 }
  0xe0   :  { %v210_v48 = vrot.slane %v209_v47, 4 }
  0xe1   :  { %v186_v49 = vadd.f32 %v185_v46, %v184_v45 }
  0xe2   :  { %v211_v50 = vadd.f32 %v210_v48, %v209_v47  ;;  %v196_v51 = vpop.xlane.xlu0 %195 }
  0xe3   :  { %v197_v52 = vrot.slane %v196_v51, 4  ;;  %v187_v53 = vrot.slane %v186_v49, 1 }
  0xe4   :  { %v212_v54 = vrot.slane %v211_v50, 2 }
  0xe5   :  { %v198_v55 = vadd.f32 %v197_v52, %v196_v51  ;;  %v188_v56 = vadd.f32 %v187_v53, %v186_v49 }
  0xe6   :  { %v213_v57 = vadd.f32 %v212_v54, %v211_v50 }
  0xe7   :  { %v199_v58 = vrot.slane %v198_v55, 2  ;;  %269 = vpush %v188_v56 }
  0xe8   :  { %v214_v59 = vrot.slane %v213_v57, 1 }
  0xe9   :  { %v200_v60 = vadd.f32 %v199_v58, %v198_v55 }
  0xea   :  { %v215_v62 = vadd.f32 %v214_v59, %v213_v57 }
  0xeb   :  { %v201_v61 = vrot.slane %v200_v60, 1 }
  0xed   :  { %v202_v63 = vadd.f32 %v201_v61, %v200_v60 }
  0xef   :  { %271 = vpush %v202_v63 }
  0xf0   :  { %273 = vpush %v215_v62 }
 0x118   :  { %s270_s10 = spop %269 }
 0x119   :  { %v190_v0 = vstv %s270_s10 }
 0x11a   :  { %v191_v1 = vmul.f32 0.015625, %v190_v0 }
 0x11c   :  { %193 = vst.msk [vmem:[#allocation16] sm:$0x1] %vm192_vm4, %v191_v1 }
 0x11d   :  { %417 = shalt.err (!%p414_p6)
}
 0x11e   :  { %229 = dma.vmem_to_hbm [thread:$0]  %s227_s5, 16, %s588_s6, [#allocation7]  }
 0x11f   :  { %s487_s16 = smov [#allocation17]   ;;  %s488_s19 = smov [#allocation19]  }
 0x120   :  { %s236_s17 = sshll.u32 %s487_s16, 4  ;;  %s272_s18 = spop %271  ;;  %s237_s17 = int_to_ptr.vmem [resolvable:$true] %s236_s17 }
 0x121   :  { %s246_s20 = sshll.u32 %s488_s19, 4  ;;  %v204_v2 = vstv %s272_s18  ;;  %s274_s1 = spop %273  ;;  %s247_s20 = int_to_ptr.vmem [resolvable:$true] %s246_s20 }
 0x122   :  { %v205_v3 = vmul.f32 0.00390625, %v204_v2  ;;  %v217_v4 = vstv %s274_s1  ;;  %s426_s21 = scalar_lea.vmem %s237_s17, 16  ;;  %s430_s22 = scalar_lea.vmem %s237_s17, 32 }
 0x123   :  { %v218_v5 = vmul.f32 0.0009765625, %v217_v4  ;;  %p427_p7 = scmp.ne.s32.totalorder %s237_s17, %s426_s21  ;;  %p431_p8 = scmp.lt.s32.totalorder %s237_s17, %s237_s17 }
 0x124   :  { %206 = vst.msk [vmem:[#allocation17] sm:$0x1] %vm192_vm4, %v205_v3  ;;  %p432_p9 = scmp.lt.s32.totalorder %s430_s22, %s426_s21 }
 0x126   :  { %p433_p10 = por %p432_p9, %p431_p8 }
 0x128   :  { %p434_p11 = pnand %p433_p10, %p427_p7 }
 0x12a   :  { %437 = shalt.err (!%p434_p11)
}
 0x12b   :  { %239 = dma.vmem_to_hbm [thread:$0]  %s237_s17, 16, %s589_s7, [#allocation18]   ;;  %219 = vst.msk [vmem:[#allocation19] sm:$0x1] %vm192_vm4, %v218_v5 }
 0x12c   :  { %s446_s23 = scalar_lea.vmem %s247_s20, 16  ;;  %s450_s24 = scalar_lea.vmem %s247_s20, 32 }
 0x12d   :  { %p447_p12 = scmp.ne.s32.totalorder %s247_s20, %s446_s23  ;;  %p451_p13 = scmp.lt.s32.totalorder %s247_s20, %s247_s20 }
 0x12e   :  { %p452_p0 = scmp.lt.s32.totalorder %s450_s24, %s446_s23 }
 0x130   :  { %p453_p1 = por %p452_p0, %p451_p13 }
 0x132   :  { %p454_p2 = pnand %p453_p1, %p447_p12 }
 0x134   :  { %457 = shalt.err (!%p454_p2)
}
 0x135   :  { %249 = dma.vmem_to_hbm [thread:$0]  %s247_s20, 16, %s590_s8, [#allocation18]  }
 0x136   :  { %474 = dma.done.wait [#allocation7], 16  }
 0x137   :  { %475 = vsyncadd [#allocation7], 4294967280 }
 0x138   :  { %476 = dma.done.wait [#allocation18], 32  }
 0x139   :  { %477 = vsyncadd [#allocation18], 4294967264 }
 0x13a   :  { %259 = vsyncpa [#allocation6], 1 }
 0x13b   :  { %260 = vsyncpa [#allocation9], 1 }
 0x13c   :  { %261 = vsyncpa [#allocation12], 1 }
 0x13d   :  { %262 = vsyncpa [#allocation15], 1 }
 0x13e   :  { %263 = vsyncpa [#allocation7], 1 }
 0x13f   :  { %264 = vsyncpa [#allocation18], 1 }

</bundles_post_ra>
